<compile_context>
chip_gen: v5e
topology: v5e:2x2
jax: 0.10.0
libtpu: 0.0.40
codegen_flags: <defaults>
</compile_context>

<pallas_src>
import functools
import math

import jax
import jax.numpy as jnp
import numpy as np
from jax.experimental import pallas as pl
from jax.experimental.pallas import tpu as pltpu

_HALF_LOG_2PI = 0.5 * math.log(2.0 * math.pi)


def _round_up(x, m):
    return (x + m - 1) // m * m


def _lgamma_digamma(x):
    """Fused (lgamma(x), digamma(x)) for x > 0, float32.

    Shift x -> w = x + 4 and use the Stirling / asymptotic series at w >= 4,
    sharing 1/w and log(w) between the two functions.  The 4-step downward
    recurrences are folded into one rational (single extra divide) and a single
    log of the product x(x+1)(x+2)(x+3).

    Cost per element: 2 divides + 2 logs + a short VALU polynomial.
    Error ~1e-7 in exact arithmetic (~1e-6 in f32) -- far inside the 1e-2 target.
    """
    a1 = x + 1.0
    a2 = x + 2.0
    a3 = x + 3.0
    p01 = x * a1
    p23 = a2 * a3
    p = p01 * p23                                # x(x+1)(x+2)(x+3)
    rec_num = p01 * (a2 + a3) + p23 * (x + a1)   # p * sum_{k=0..3} 1/(x+k)

    w = x + 4.0
    inv_w = 1.0 / w                              # divide #1
    rec = rec_num / p                            # divide #2
    log_w = jnp.log(w)                           # log #1
    log_p = jnp.log(p)                           # log #2
    inv2 = inv_w * inv_w

    # Stirling series: lgamma(w) for w >= 4.
    lgamma_w = (
        (w - 0.5) * log_w - w + _HALF_LOG_2PI
        + inv_w * (1.0 / 12.0 - inv2 * (1.0 / 360.0 - inv2 * (1.0 / 1260.0)))
    )
    # Asymptotic series: digamma(w) for w >= 4.
    digamma_w = (
        log_w - 0.5 * inv_w
        - inv2 * (1.0 / 12.0 - inv2 * (1.0 / 120.0 - inv2 * (1.0 / 252.0)))
    )
    # Undo the shift: lgamma(x) = lgamma(x+4) - log(p), digamma(x) = digamma(x+4) - rec.
    return lgamma_w - log_p, digamma_w - rec


def _kldiv_kernel(labels_ref, outs_ref, kl_ref, *, num_classes):
    # Refs are (K, tn): classes on sublanes, batch rows on lanes (lane-dense).
    labels = labels_ref[...]
    outs = outs_ref[...]

    # _alphas = labels + (1 - labels) * (outs + 1) == 1 + (1 - labels) * outs
    a = 1.0 + (1.0 - labels) * outs

    lg_a, psi_a = _lgamma_digamma(a)                      # (K, tn)
    s = jnp.sum(a, axis=0, keepdims=True)                 # (1, tn)
    # Folded class-axis reduction: sum_k [ (a-1)*psi(a) - lgamma(a) ]
    r = jnp.sum((a - 1.0) * psi_a - lg_a, axis=0, keepdims=True)

    lg_s, psi_s = _lgamma_digamma(s)                      # (1, tn) -- cheap (1/K of work)

    kf = float(num_classes)
    lgamma_k = float(math.lgamma(kf))
    # kl = lgamma(s) - lgamma(K) - sum_k lgamma(a)
    #      + sum_k (a-1)*psi(a) - (s - K)*psi(s)
    # Padded (all-zero) columns give a == 1, s == K  ->  kl == 0 exactly.
    kl_ref[...] = lg_s - lgamma_k + r - (s - kf) * psi_s


def kldiv_pallas(labels, outs, *, tn_lanes=2048):
    """Mean Dirichlet-KL regularizer, matching the PyTorch KLDiv.forward."""
    assert labels.shape == outs.shape and labels.ndim == 2
    n, k = labels.shape
    labels = labels.astype(jnp.float32)
    outs = outs.astype(jnp.float32)

    # Lane-dense layout: batch rows on lanes (multiple of 128), classes on sublanes.
    tn = min(int(tn_lanes), _round_up(n, 128))
    n_pad = _round_up(n, tn)

    lab_t = jnp.transpose(labels)   # (K, N)
    out_t = jnp.transpose(outs)
    if n_pad != n:
        pad = ((0, 0), (0, n_pad - n))
        # Zero-padded rows give _alphas == 1 -> exactly 0 KL contribution.
        lab_t = jnp.pad(lab_t, pad)
        out_t = jnp.pad(out_t, pad)

    kernel = functools.partial(_kldiv_kernel, num_classes=k)
    kl = pl.pallas_call(
        kernel,
        out_shape=jax.ShapeDtypeStruct((1, n_pad), jnp.float32),
        grid_spec=pltpu.PrefetchScalarGridSpec(
            num_scalar_prefetch=0,
            grid=(n_pad // tn,),
            in_specs=[
                pl.BlockSpec((k, tn), lambda i: (0, i)),
                pl.BlockSpec((k, tn), lambda i: (0, i)),
            ],
            out_specs=pl.BlockSpec((1, tn), lambda i: (0, i)),
        ),
        compiler_params=pltpu.CompilerParams(
            # Tiles are fully independent (no resident accumulator), so the grid
            # axis is parallel -> both TensorCores on v7x, no-op on v5e/v6e.
            dimension_semantics=("parallel",),
            vmem_limit_bytes=32 * 1024 * 1024,
        ),
    )(lab_t, out_t)

    # Final reduction + mean over the TRUE batch size in the wrapper.
    return jnp.sum(kl) / jnp.float32(n)


def kldiv_reference(labels, outs):
    """Plain-JAX reference matching the PyTorch module."""
    k = labels.shape[-1]
    alphas = outs + 1.0
    _alphas = labels + (1.0 - labels) * alphas
    s = jnp.sum(_alphas, axis=1, keepdims=True)
    lognum = jax.scipy.special.gammaln(s)
    logden = jax.scipy.special.gammaln(jnp.float32(k)) + jnp.sum(
        jax.scipy.special.gammaln(_alphas), axis=1, keepdims=True
    )
    t2 = jnp.sum(
        (_alphas - 1.0)
        * (jax.scipy.special.digamma(_alphas) - jax.scipy.special.digamma(s)),
        axis=1,
        keepdims=True,
    )
    return jnp.mean(lognum - logden + t2)


if __name__ == "__main__":
    key = jax.random.PRNGKey(0)

    # Test 1: small shapes from the original harness (N=16, K=32).
    N, K = 16, 32
    k_lbl, k_out, key = jax.random.split(key, 3)
    classes = jax.random.randint(k_lbl, (N,), 0, K)
    labels = jax.nn.one_hot(classes, K, dtype=jnp.float32)
    outs = jax.nn.softplus(jax.random.normal(k_out, (N, K), dtype=jnp.float32)) * 3.0

    result = kldiv_pallas(labels, outs)
    jax.block_until_ready(result)
    ref = kldiv_reference(labels, outs)
    np.testing.assert_allclose(
        np.asarray(result), np.asarray(ref), rtol=1e-2, atol=1e-2
    )

    # Test 2: batch not a multiple of 128 (exercises the zero-padding path).
    N2, K2 = 200, 32
    k_lbl2, k_out2 = jax.random.split(key)
    classes2 = jax.random.randint(k_lbl2, (N2,), 0, K2)
    labels2 = jax.nn.one_hot(classes2, K2, dtype=jnp.float32)
    outs2 = jax.nn.softplus(jax.random.normal(k_out2, (N2, K2), dtype=jnp.float32)) * 3.0

    result2 = kldiv_pallas(labels2, outs2)
    jax.block_until_ready(result2)
    ref2 = kldiv_reference(labels2, outs2)
    np.testing.assert_allclose(
        np.asarray(result2), np.asarray(ref2), rtol=1e-2, atol=1e-2
    )

    print("KERNEL_OK")
</pallas_src>

<mosaic_0001>
module attributes {stable_mosaic.version = 11 : i64} {
  func.func @_kldiv_kernel(%arg0: i32, %arg1: memref<32x128xf32, #tpu.memory_space<vmem>>, %arg2: memref<32x128xf32, #tpu.memory_space<vmem>>, %arg3: memref<1x128xf32, #tpu.memory_space<vmem>>) attributes {dimension_semantics = [#tpu.dimension_semantics<parallel>], iteration_bounds = array<i64: 1>, scalar_prefetch = 0 : i64, scratch_operands = 0 : i64, tpu.core_type = #tpu.core_type<tc>, window_params = [{transform_indices = @transform_0, window_bounds = array<i64: 32, 128>}, {transform_indices = @transform_1, window_bounds = array<i64: 32, 128>}, {transform_indices = @transform_2, window_bounds = array<i64: 1, 128>}]} {
    %c0 = arith.constant 0 : index
    %c0_0 = arith.constant 0 : index
    %0 = vector.load %arg1[%c0, %c0_0] : memref<32x128xf32, #tpu.memory_space<vmem>>, vector<32x128xf32>
    %c0_1 = arith.constant 0 : index
    %c0_2 = arith.constant 0 : index
    %1 = vector.load %arg2[%c0_1, %c0_2] : memref<32x128xf32, #tpu.memory_space<vmem>>, vector<32x128xf32>
    %cst = arith.constant 1.000000e+00 : f32
    %2 = vector.broadcast %cst : f32 to vector<32x128xf32>
    %3 = arith.subf %2, %0 : vector<32x128xf32>
    %4 = arith.mulf %3, %1 : vector<32x128xf32>
    %cst_3 = arith.constant 1.000000e+00 : f32
    %5 = vector.broadcast %cst_3 : f32 to vector<32x128xf32>
    %6 = arith.addf %5, %4 : vector<32x128xf32>
    %cst_4 = arith.constant 1.000000e+00 : f32
    %7 = vector.broadcast %cst_4 : f32 to vector<32x128xf32>
    %8 = arith.addf %6, %7 : vector<32x128xf32>
    %cst_5 = arith.constant 2.000000e+00 : f32
    %9 = vector.broadcast %cst_5 : f32 to vector<32x128xf32>
    %10 = arith.addf %6, %9 : vector<32x128xf32>
    %cst_6 = arith.constant 3.000000e+00 : f32
    %11 = vector.broadcast %cst_6 : f32 to vector<32x128xf32>
    %12 = arith.addf %6, %11 : vector<32x128xf32>
    %13 = arith.mulf %6, %8 : vector<32x128xf32>
    %14 = arith.mulf %10, %12 : vector<32x128xf32>
    %15 = arith.mulf %13, %14 : vector<32x128xf32>
    %16 = arith.addf %10, %12 : vector<32x128xf32>
    %17 = arith.mulf %13, %16 : vector<32x128xf32>
    %18 = arith.addf %6, %8 : vector<32x128xf32>
    %19 = arith.mulf %14, %18 : vector<32x128xf32>
    %20 = arith.addf %17, %19 : vector<32x128xf32>
    %cst_7 = arith.constant 4.000000e+00 : f32
    %21 = vector.broadcast %cst_7 : f32 to vector<32x128xf32>
    %22 = arith.addf %6, %21 : vector<32x128xf32>
    %cst_8 = arith.constant 1.000000e+00 : f32
    %23 = vector.broadcast %cst_8 : f32 to vector<32x128xf32>
    %24 = arith.divf %23, %22 : vector<32x128xf32>
    %25 = arith.divf %20, %15 : vector<32x128xf32>
    %26 = math.log %22 : vector<32x128xf32>
    %27 = math.log %15 : vector<32x128xf32>
    %28 = arith.mulf %24, %24 : vector<32x128xf32>
    %cst_9 = arith.constant 5.000000e-01 : f32
    %29 = vector.broadcast %cst_9 : f32 to vector<32x128xf32>
    %30 = arith.subf %22, %29 : vector<32x128xf32>
    %31 = arith.mulf %30, %26 : vector<32x128xf32>
    %32 = arith.subf %31, %22 : vector<32x128xf32>
    %cst_10 = arith.constant 0.918938517 : f32
    %33 = vector.broadcast %cst_10 : f32 to vector<32x128xf32>
    %34 = arith.addf %32, %33 : vector<32x128xf32>
    %cst_11 = arith.constant 7.93650805E-4 : f32
    %35 = vector.broadcast %cst_11 : f32 to vector<32x128xf32>
    %36 = arith.mulf %28, %35 : vector<32x128xf32>
    %cst_12 = arith.constant 0.00277777785 : f32
    %37 = vector.broadcast %cst_12 : f32 to vector<32x128xf32>
    %38 = arith.subf %37, %36 : vector<32x128xf32>
    %39 = arith.mulf %28, %38 : vector<32x128xf32>
    %cst_13 = arith.constant 0.0833333358 : f32
    %40 = vector.broadcast %cst_13 : f32 to vector<32x128xf32>
    %41 = arith.subf %40, %39 : vector<32x128xf32>
    %42 = arith.mulf %24, %41 : vector<32x128xf32>
    %43 = arith.addf %34, %42 : vector<32x128xf32>
    %cst_14 = arith.constant 5.000000e-01 : f32
    %44 = vector.broadcast %cst_14 : f32 to vector<32x128xf32>
    %45 = arith.mulf %44, %24 : vector<32x128xf32>
    %46 = arith.subf %26, %45 : vector<32x128xf32>
    %cst_15 = arith.constant 0.0039682542 : f32
    %47 = vector.broadcast %cst_15 : f32 to vector<32x128xf32>
    %48 = arith.mulf %28, %47 : vector<32x128xf32>
    %cst_16 = arith.constant 0.00833333377 : f32
    %49 = vector.broadcast %cst_16 : f32 to vector<32x128xf32>
    %50 = arith.subf %49, %48 : vector<32x128xf32>
    %51 = arith.mulf %28, %50 : vector<32x128xf32>
    %cst_17 = arith.constant 0.0833333358 : f32
    %52 = vector.broadcast %cst_17 : f32 to vector<32x128xf32>
    %53 = arith.subf %52, %51 : vector<32x128xf32>
    %54 = arith.mulf %28, %53 : vector<32x128xf32>
    %55 = arith.subf %46, %54 : vector<32x128xf32>
    %56 = arith.subf %43, %27 : vector<32x128xf32>
    %57 = arith.subf %55, %25 : vector<32x128xf32>
    %cst_18 = arith.constant dense<0.000000e+00> : vector<128xf32>
    %58 = vector.multi_reduction <add>, %6, %cst_18 [0] : vector<32x128xf32> to vector<128xf32>
    %59 = vector.shape_cast %58 : vector<128xf32> to vector<1x128xf32>
    %cst_19 = arith.constant 1.000000e+00 : f32
    %60 = vector.broadcast %cst_19 : f32 to vector<32x128xf32>
    %61 = arith.subf %6, %60 : vector<32x128xf32>
    %62 = arith.mulf %61, %57 : vector<32x128xf32>
    %63 = arith.subf %62, %56 : vector<32x128xf32>
    %cst_20 = arith.constant dense<0.000000e+00> : vector<128xf32>
    %64 = vector.multi_reduction <add>, %63, %cst_20 [0] : vector<32x128xf32> to vector<128xf32>
    %65 = vector.shape_cast %64 : vector<128xf32> to vector<1x128xf32>
    %cst_21 = arith.constant 1.000000e+00 : f32
    %66 = vector.broadcast %cst_21 : f32 to vector<1x128xf32>
    %67 = arith.addf %59, %66 : vector<1x128xf32>
    %cst_22 = arith.constant 2.000000e+00 : f32
    %68 = vector.broadcast %cst_22 : f32 to vector<1x128xf32>
    %69 = arith.addf %59, %68 : vector<1x128xf32>
    %cst_23 = arith.constant 3.000000e+00 : f32
    %70 = vector.broadcast %cst_23 : f32 to vector<1x128xf32>
    %71 = arith.addf %59, %70 : vector<1x128xf32>
    %72 = arith.mulf %59, %67 : vector<1x128xf32>
    %73 = arith.mulf %69, %71 : vector<1x128xf32>
    %74 = arith.mulf %72, %73 : vector<1x128xf32>
    %75 = arith.addf %69, %71 : vector<1x128xf32>
    %76 = arith.mulf %72, %75 : vector<1x128xf32>
    %77 = arith.addf %59, %67 : vector<1x128xf32>
    %78 = arith.mulf %73, %77 : vector<1x128xf32>
    %79 = arith.addf %76, %78 : vector<1x128xf32>
    %cst_24 = arith.constant 4.000000e+00 : f32
    %80 = vector.broadcast %cst_24 : f32 to vector<1x128xf32>
    %81 = arith.addf %59, %80 : vector<1x128xf32>
    %cst_25 = arith.constant 1.000000e+00 : f32
    %82 = vector.broadcast %cst_25 : f32 to vector<1x128xf32>
    %83 = arith.divf %82, %81 : vector<1x128xf32>
    %84 = arith.divf %79, %74 : vector<1x128xf32>
    %85 = math.log %81 : vector<1x128xf32>
    %86 = math.log %74 : vector<1x128xf32>
    %87 = arith.mulf %83, %83 : vector<1x128xf32>
    %cst_26 = arith.constant 5.000000e-01 : f32
    %88 = vector.broadcast %cst_26 : f32 to vector<1x128xf32>
    %89 = arith.subf %81, %88 : vector<1x128xf32>
    %90 = arith.mulf %89, %85 : vector<1x128xf32>
    %91 = arith.subf %90, %81 : vector<1x128xf32>
    %cst_27 = arith.constant 0.918938517 : f32
    %92 = vector.broadcast %cst_27 : f32 to vector<1x128xf32>
    %93 = arith.addf %91, %92 : vector<1x128xf32>
    %cst_28 = arith.constant 7.93650805E-4 : f32
    %94 = vector.broadcast %cst_28 : f32 to vector<1x128xf32>
    %95 = arith.mulf %87, %94 : vector<1x128xf32>
    %cst_29 = arith.constant 0.00277777785 : f32
    %96 = vector.broadcast %cst_29 : f32 to vector<1x128xf32>
    %97 = arith.subf %96, %95 : vector<1x128xf32>
    %98 = arith.mulf %87, %97 : vector<1x128xf32>
    %cst_30 = arith.constant 0.0833333358 : f32
    %99 = vector.broadcast %cst_30 : f32 to vector<1x128xf32>
    %100 = arith.subf %99, %98 : vector<1x128xf32>
    %101 = arith.mulf %83, %100 : vector<1x128xf32>
    %102 = arith.addf %93, %101 : vector<1x128xf32>
    %cst_31 = arith.constant 5.000000e-01 : f32
    %103 = vector.broadcast %cst_31 : f32 to vector<1x128xf32>
    %104 = arith.mulf %103, %83 : vector<1x128xf32>
    %105 = arith.subf %85, %104 : vector<1x128xf32>
    %cst_32 = arith.constant 0.0039682542 : f32
    %106 = vector.broadcast %cst_32 : f32 to vector<1x128xf32>
    %107 = arith.mulf %87, %106 : vector<1x128xf32>
    %cst_33 = arith.constant 0.00833333377 : f32
    %108 = vector.broadcast %cst_33 : f32 to vector<1x128xf32>
    %109 = arith.subf %108, %107 : vector<1x128xf32>
    %110 = arith.mulf %87, %109 : vector<1x128xf32>
    %cst_34 = arith.constant 0.0833333358 : f32
    %111 = vector.broadcast %cst_34 : f32 to vector<1x128xf32>
    %112 = arith.subf %111, %110 : vector<1x128xf32>
    %113 = arith.mulf %87, %112 : vector<1x128xf32>
    %114 = arith.subf %105, %113 : vector<1x128xf32>
    %115 = arith.subf %102, %86 : vector<1x128xf32>
    %116 = arith.subf %114, %84 : vector<1x128xf32>
    %cst_35 = arith.constant 78.0922241 : f32
    %117 = vector.broadcast %cst_35 : f32 to vector<1x128xf32>
    %118 = arith.subf %115, %117 : vector<1x128xf32>
    %119 = arith.addf %118, %65 : vector<1x128xf32>
    %cst_36 = arith.constant 3.200000e+01 : f32
    %120 = vector.broadcast %cst_36 : f32 to vector<1x128xf32>
    %121 = arith.subf %59, %120 : vector<1x128xf32>
    %122 = arith.mulf %121, %116 : vector<1x128xf32>
    %123 = arith.subf %119, %122 : vector<1x128xf32>
    %c0_37 = arith.constant 0 : index
    %c0_38 = arith.constant 0 : index
    %124 = vector.load %arg3[%c0_37, %c0_38] : memref<1x128xf32, #tpu.memory_space<vmem>>, vector<1x128xf32>
    tpu.vector_store %arg3[%c0_37, %c0_38], %123 {strides = array<i32>} : memref<1x128xf32, #tpu.memory_space<vmem>>, vector<1x128xf32>,
    return
  }
  func.func @transform_0(%arg0: i32) -> (i32, i32) {
    %c0_i32 = arith.constant 0 : i32
    %c0_i32_0 = arith.constant 0 : i32
    return %c0_i32, %arg0 : i32, i32
  }
  func.func @transform_1(%arg0: i32) -> (i32, i32) {
    %c0_i32 = arith.constant 0 : i32
    %c0_i32_0 = arith.constant 0 : i32
    return %c0_i32, %arg0 : i32, i32
  }
  func.func @transform_2(%arg0: i32) -> (i32, i32) {
    %c0_i32 = arith.constant 0 : i32
    %c0_i32_0 = arith.constant 0 : i32
    return %c0_i32, %arg0 : i32, i32
  }
}

</mosaic_0001>

<bundles_post_ra>
// kernel: tpu_custom_call.1
= control target key start
LH: loop header
LB: loop body
LE: loop exit
PB: predicated region body
PF: predicated region fallthrough
CT: control target
= control target key end

     0   :  { %7 = vsyncpa [#allocation3], 0  ;;  %s1030_s0 = inlined_call_operand.hbm [shape: f32[32,128], index: 0, kind: input, shape index: {}]   ;;  %s1031_s1 = inlined_call_operand.hbm [shape: f32[32,128], index: 1, kind: input, shape index: {}]   ;;  %s1032_s2 = inlined_call_operand.hbm [shape: f32[1,128], index: 2, kind: output, shape index: {}]  }
   0x1   :  { %8 = vsyncpa [#allocation6], 0 }
   0x2   :  { %9 = vsyncpa [#allocation4], 0  ;;  %s14_s11 = sshll.u32 %s1030_s0, 4  ;;  %s587_s12 = smov [#allocation2]   ;;  %s15_s11 = int_to_ptr.hbm [resolvable:$true] %s14_s11 }
   0x3   :  { %s16_s13 = sshll.u32 %s587_s12, 4  ;;  %s27_s16 = sshll.u32 %s1031_s1, 4  ;;  %s17_s13 = int_to_ptr.vmem [resolvable:$true] %s16_s13  ;;  %s28_s16 = int_to_ptr.hbm [resolvable:$true] %s27_s16 }
   0x4   :  { %s588_s17 = smov 128   ;;  %s589_s18 = smov 8  }
   0x5   :  { %22 = dma.hbm_to_vmem [thread:$0]  %s15_s11, 512, %s17_s13, [#allocation3], %s588_s17, %s588_s17, %s589_s18  }
   0x6   :  { %s590_s19 = smov [#allocation5]  }
   0x7   :  { %s29_s20 = sshll.u32 %s590_s19, 4  ;;  %s30_s20 = int_to_ptr.vmem [resolvable:$true] %s29_s20 }
   0x8   :  { %35 = dma.hbm_to_vmem [thread:$0]  %s28_s16, 512, %s30_s20, [#allocation6], %s588_s17, %s588_s17, %s589_s18  }
   0x9   :  { %581 = dma.done.wait [#allocation3], 512  }
   0xa   :  { %582 = vsyncadd [#allocation3], 4294966784 }
   0xb   :  { %583 = dma.done.wait [#allocation6], 512  }
   0xc   :  { %584 = vsyncadd [#allocation6], 4294966784  ;;  %v44_v0 = vld [vmem:[#allocation2] sm:$0xff]  ;;  %v45_v1 = vld [vmem:[#allocation2 + $0x8] sm:$0xff]  ;;  %s591_s0 = smov [#allocation7]   ;;  %s442_s23 = sshll.u32 %s1032_s2, 4  ;;  %s443_s23 = int_to_ptr.hbm [resolvable:$true] %s442_s23 }
   0xd   :  { %v46_v2 = vld [vmem:[#allocation2 + $0x10] sm:$0xff]  ;;  %v47_v3 = vld [vmem:[#allocation2 + $0x18] sm:$0xff]  ;;  %v48_v4 = vld [vmem:[#allocation5] sm:$0xff]  ;;  %v52_v6 = vsub.f32 1.0, %v44_v0  ;;  %v53_v7 = vsub.f32 1.0, %v45_v1  ;;  %s440_s1 = sshll.u32 %s591_s0, 4  ;;  %s441_s1 = int_to_ptr.vmem [resolvable:$true] %s440_s1 }
   0xe   :  { %v49_v5 = vld [vmem:[#allocation5 + $0x8] sm:$0xff]  ;;  %v54_v8 = vsub.f32 1.0, %v46_v2  ;;  %v50_v9 = vld [vmem:[#allocation5 + $0x10] sm:$0xff]  ;;  %v55_v10 = vsub.f32 1.0, %v47_v3  ;;  %v51_v11 = vld [vmem:[#allocation5 + $0x18] sm:$0xff] }
   0xf   :  { %v56_v12 = vmul.f32 %v52_v6, %v48_v4  ;;  %v57_v13 = vmul.f32 %v53_v7, %v49_v5 }
  0x10   :  { %v58_v14 = vmul.f32 %v54_v8, %v50_v9  ;;  %v59_v15 = vmul.f32 %v55_v10, %v51_v11 }
  0x11   :  { %v613_v16 = vadd.f32 1.0, %v56_v12  ;;  %v615_v17 = vadd.f32 1.0, %v57_v13 }
  0x12   :  { %v617_v18 = vadd.f32 1.0, %v58_v14  ;;  %v619_v19 = vadd.f32 1.0, %v59_v15 }
  0x13   :  { %v64_v20 = vadd.f32 1.0, %v613_v16  ;;  %v65_v21 = vadd.f32 1.0, %v615_v17  ;;  %v68_v23 = vadd.f32 2.0, %v613_v16  ;;  %v69_v24 = vadd.f32 2.0, %v615_v17 }
  0x14   :  { %v66_v22 = vadd.f32 1.0, %v617_v18  ;;  %v72_v25 = vadd.f32 3.0, %v613_v16  ;;  %v73_v26 = vadd.f32 3.0, %v615_v17  ;;  %v67_v27 = vadd.f32 1.0, %v619_v19 }
  0x15   :  { %v70_v28 = vadd.f32 2.0, %v617_v18  ;;  %v71_v29 = vadd.f32 2.0, %v619_v19  ;;  %v74_v30 = vadd.f32 3.0, %v617_v18  ;;  %v75_v31 = vadd.f32 3.0, %v619_v19 }
  0x16   :  { %v76_v32 = vmul.f32 %v64_v20, %v613_v16  ;;  %v77_v33 = vmul.f32 %v65_v21, %v615_v17  ;;  %v78_v34 = vmul.f32 %v66_v22, %v617_v18  ;;  %v80_v35 = vmul.f32 %v72_v25, %v68_v23 }
  0x17   :  { %v81_v36 = vmul.f32 %v73_v26, %v69_v24  ;;  %v88_v37 = vadd.f32 %v72_v25, %v68_v23  ;;  %v89_v38 = vadd.f32 %v73_v26, %v69_v24  ;;  %v90_v39 = vadd.f32 %v74_v30, %v70_v28 }
  0x18   :  { %v637_v40 = vadd.f32 4.0, %v613_v16  ;;  %v640_v41 = vadd.f32 4.0, %v615_v17  ;;  %v91_v42 = vadd.f32 %v75_v31, %v71_v29  ;;  %v96_v43 = vadd.f32 %v64_v20, %v613_v16 }
  0x19   :  { %v97_v44 = vadd.f32 %v65_v21, %v615_v17  ;;  %v645_v45 = vadd.f32 4.0, %v617_v18  ;;  %v98_v46 = vadd.f32 %v66_v22, %v617_v18  ;;  %v99_v47 = vadd.f32 %v67_v27, %v619_v19 }
  0x1a   :  { %v650_v48 = vadd.f32 4.0, %v619_v19  ;;  %469 = vrcp.f32 %v637_v40  ;;  %v79_v49 = vmul.f32 %v67_v27, %v619_v19  ;;  %v82_v50 = vmul.f32 %v74_v30, %v70_v28 }
  0x1b   :  { %v83_v51 = vmul.f32 %v75_v31, %v71_v29  ;;  %v654_v52 = vmul.f32 %v80_v35, %v76_v32  ;;  %v656_v53 = vmul.f32 %v81_v36, %v77_v33  ;;  %v92_v54 = vmul.f32 %v88_v37, %v76_v32 }
  0x1c   :  { %v93_v55 = vmul.f32 %v89_v38, %v77_v33  ;;  %471 = vrcp.f32 %v640_v41  ;;  %v94_v56 = vmul.f32 %v90_v39, %v78_v34  ;;  %v95_v57 = vmul.f32 %v91_v42, %v79_v49 }
  0x1d   :  { %v100_v58 = vmul.f32 %v96_v43, %v80_v35  ;;  %473 = vrcp.f32 %v645_v45  ;;  %v101_v59 = vmul.f32 %v97_v44, %v81_v36  ;;  %v102_v60 = vmul.f32 %v98_v46, %v82_v50 }
  0x1e   :  { %v103_v61 = vmul.f32 %v99_v47, %v83_v51  ;;  %475 = vrcp.f32 %v650_v48  ;;  %v123_v62 = vand.u32 2147483648, %v637_v40  ;;  %v664_v0 = vmul.f32 %v82_v50, %v78_v34 }
  0x1f   :  { %v666_v1 = vmul.f32 %v83_v51, %v79_v49  ;;  %477 = vrcp.f32 %v654_v52  ;;  %v669_v2 = vadd.f32 %v100_v58, %v92_v54  ;;  %vm117_vm0 = vweird.f32 %v637_v40 }
  0x20   :  { %v662_v63 = vpop.eup %469  ;;  %v121_v4 = vand.u32 2147483647, %v637_v40  ;;  %v677_v6 = vadd.f32 %v101_v59, %v93_v55  ;;  %v679_v7 = vadd.f32 %v102_v60, %v94_v56  ;;  %v681_v8 = vadd.f32 %v103_v61, %v95_v57 }
  0x21   :  { %v113_v3 = vmul.f32 %v662_v63, %v637_v40  ;;  %479 = vrcp.f32 %v656_v53  ;;  %v686_v10 = vor.u32 1.1754944e-38, %v123_v62  ;;  %vm132_vm1 = vweird.f32 %v640_v41 }
  0x22   :  { %v675_v5 = vpop.eup %471  ;;  %v138_v12 = vand.u32 2147483648, %v640_v41  ;;  %v136_v15 = vand.u32 2147483647, %v640_v41  ;;  %vm147_vm2 = vweird.f32 %v645_v45  ;;  %v151_v22 = vand.u32 2147483647, %v645_v45 }
  0x23   :  { %v684_v9 = vpop.eup %473  ;;  %v128_v11 = vmul.f32 %v675_v5, %v640_v41  ;;  %v114_v14 = vsub.f32 1.0, %v113_v3  ;;  %v153_v23 = vand.u32 2147483648, %v645_v45  ;;  %vm162_vm3 = vweird.f32 %v650_v48 }
  0x24   :  { %v692_v13 = vpop.eup %475  ;;  %v143_v20 = vmul.f32 %v684_v9, %v645_v45  ;;  %v166_v27 = vand.u32 2147483647, %v650_v48  ;;  %481 = vrcp.f32 %v664_v0  ;;  %v707_v28 = vor.u32 1.1754944e-38, %v138_v12 }
  0x25   :  { %v129_v21 = vsub.f32 1.0, %v128_v11  ;;  %v158_v24 = vmul.f32 %v692_v13, %v650_v48  ;;  %v702_v25 = vpop.eup %477  ;;  %v168_v30 = vand.u32 2147483648, %v650_v48  ;;  %v115_v33 = vmul.f32 %v662_v63, %v114_v14 }
  0x26   :  { %v144_v26 = vsub.f32 1.0, %v143_v20  ;;  %v173_v31 = vmul.f32 %v702_v25, %v654_v52  ;;  %vm118_vm4 = vweird.f32 %v662_v63  ;;  %vm716_vm5 = vcmp.eq.f32.partialorder %v121_v4, 8.507059e+37 }
  0x27   :  { %v159_v29 = vsub.f32 1.0, %v158_v24  ;;  %v712_v32 = vpop.eup %479  ;;  %v130_v35 = vmul.f32 %v675_v5, %v129_v21  ;;  %vm133_vm6 = vweird.f32 %v675_v5  ;;  %vm723_vm7 = vcmp.eq.f32.partialorder %v136_v15, 8.507059e+37  ;;  %vm742_vm12 = vmor %vm117_vm0, %vm118_vm4 }
  0x28   :  { %v145_v36 = vmul.f32 %v684_v9, %v144_v26  ;;  %vm727_vm8 = vcmp.eq.f32.partialorder %v151_v22, 8.507059e+37  ;;  %v154_v39 = vor.u32 1.1754944e-38, %v153_v23  ;;  %v174_v43 = vsub.f32 1.0, %v173_v31  ;;  %vm758_vm14 = vmor %vm132_vm1, %vm133_vm6 }
  0x29   :  { %v160_v42 = vmul.f32 %v692_v13, %v159_v29  ;;  %vm148_vm9 = vweird.f32 %v684_v9  ;;  %vm733_vm10 = vcmp.eq.f32.partialorder %v166_v27, 8.507059e+37  ;;  %vm177_vm11 = vweird.f32 %v654_v52 }
  0x2a   :  { %v188_v46 = vmul.f32 %v712_v32, %v656_v53  ;;  %vm163_vm13 = vweird.f32 %v692_v13  ;;  %v175_v49 = vmul.f32 %v702_v25, %v174_v43  ;;  %v181_v50 = vand.u32 2147483647, %v654_v52  ;;  %v750_v54 = vpop.eup %481  ;;  %vm768_vm0 = vmor %vm147_vm2, %vm148_vm9 }
  0x2b   :  { %v183_v51 = vand.u32 2147483648, %v654_v52  ;;  %v116_v55 = vadd.f32 %v662_v63, %v115_v33  ;;  %v131_v56 = vadd.f32 %v675_v5, %v130_v35  ;;  %v146_v58 = vadd.f32 %v684_v9, %v145_v36  ;;  %vm779_vm1 = vmor %vm162_vm3, %vm163_vm13 }
  0x2c   :  { %vm178_vm15 = vweird.f32 %v702_v25  ;;  %v161_v60 = vadd.f32 %v692_v13, %v160_v42  ;;  %v169_v61 = vor.u32 1.1754944e-38, %v168_v30  ;;  %v189_v62 = vsub.f32 1.0, %v188_v46 }
  0x2d   :  { %v203_v3 = vmul.f32 %v750_v54, %v664_v0  ;;  %v176_v11 = vadd.f32 %v702_v25, %v175_v49  ;;  %vm192_vm2 = vweird.f32 %v656_v53  ;;  %v196_v12 = vand.u32 2147483647, %v656_v53  ;;  %vm789_vm4 = vmor %vm177_vm11, %vm178_vm15 }
  0x2e   :  { %v198_v14 = vand.u32 2147483648, %v656_v53  ;;  %vm793_vm6 = vcmp.eq.f32.partialorder %v181_v50, 8.507059e+37  ;;  %v184_v21 = vor.u32 1.1754944e-38, %v183_v51  ;;  %483 = vrcp.f32 %v666_v1 }
  0x2f   :  { %v204_v22 = vsub.f32 1.0, %v203_v3  ;;  %v120_v23 = vsel %vm742_vm12, %v662_v63, %v116_v55  ;;  %v135_v24 = vsel %vm758_vm14, %v675_v5, %v131_v56  ;;  %v150_v26 = vsel %vm768_vm0, %v684_v9, %v146_v58 }
  0x30   :  { %v211_v27 = vand.u32 2147483647, %v664_v0  ;;  %v165_v29 = vsel %vm779_vm1, %v692_v13, %v161_v60  ;;  %v190_v30 = vmul.f32 %v712_v32, %v189_v62  ;;  %v213_v31 = vand.u32 2147483648, %v664_v0 }
  0x31   :  { %485 = vlog2.f32 %v637_v40  ;;  %v180_v63 = vsel %vm789_vm4, %v702_v25, %v176_v11  ;;  %vm817_vm3 = vcmp.eq.f32.partialorder %v196_v12, 8.507059e+37  ;;  %v199_v9 = vor.u32 1.1754944e-38, %v198_v14 }
  0x32   :  { %vm207_vm9 = vweird.f32 %v664_v0  ;;  %487 = vlog2.f32 %v640_v41  ;;  %v826_v13 = vsel %vm716_vm5, %v686_v10, %v120_v23  ;;  %vm193_vm11 = vweird.f32 %v712_v32 }
  0x33   :  { %v205_v33 = vmul.f32 %v750_v54, %v204_v22  ;;  %489 = vlog2.f32 %v645_v45  ;;  %v834_v25 = vsel %vm723_vm7, %v707_v28, %v135_v24  ;;  %v838_v35 = vsel %vm727_vm8, %v154_v39, %v150_v26  ;;  %vm856_vm7 = vmor %vm192_vm2, %vm193_vm11 }
  0x34   :  { %v842_v34 = vsel %vm733_vm10, %v169_v61, %v165_v29  ;;  %vm208_vm5 = vweird.f32 %v750_v54  ;;  %v845_v10 = vpop.eup %483  ;;  %v185_v36 = vsel %vm793_vm6, %v184_v21, %v180_v63  ;;  %v191_v42 = vadd.f32 %v712_v32, %v190_v30 }
  0x35   :  { %vm850_vm12 = vcmp.eq.f32.partialorder %v211_v27, 8.507059e+37  ;;  %v214_v37 = vor.u32 1.1754944e-38, %v213_v31  ;;  %v218_v39 = vmul.f32 %v845_v10, %v666_v1  ;;  %vm222_vm8 = vweird.f32 %v666_v1  ;;  %vm876_vm10 = vmor %vm207_vm9, %vm208_vm5 }
  0x36   :  { %v226_v43 = vand.u32 2147483647, %v666_v1  ;;  %491 = vlog2.f32 %v650_v48  ;;  %v206_v46 = vadd.f32 %v750_v54, %v205_v33  ;;  %v228_v47 = vand.u32 2147483648, %v666_v1 }
  0x37   :  { %v486_v44 = vpop.eup %485  ;;  %v869_v49 = vmul.f32 %v826_v13, %v826_v13  ;;  %v453_v50 = vadd.f32 -0.5, %v637_v40  ;;  %v219_v56 = vsub.f32 1.0, %v218_v39  ;;  %v454_v58 = vadd.f32 -0.5, %v640_v41 }
  0x38   :  { %v488_v51 = vpop.eup %487  ;;  %v880_v57 = vmul.f32 0.6931472, %v486_v44  ;;  %v455_v59 = vadd.f32 -0.5, %v645_v45  ;;  %v195_v61 = vsel %vm856_vm7, %v712_v32, %v191_v42  ;;  %493 = vlog2.f32 %v654_v52 }
  0x39   :  { %v490_v60 = vpop.eup %489  ;;  %v887_v62 = vmul.f32 0.6931472, %v488_v51  ;;  %v892_v3 = vmul.f32 %v834_v25, %v834_v25  ;;  %v220_v4 = vmul.f32 %v845_v10, %v219_v56  ;;  %495 = vlog2.f32 %v656_v53 }
  0x3a   :  { %v895_v11 = vmul.f32 0.6931472, %v490_v60  ;;  %v268_v12 = vmul.f32 0.0007936508, %v869_v49  ;;  %v210_v32 = vsel %vm876_vm10, %v750_v54, %v206_v46  ;;  %vm223_vm13 = vweird.f32 %v845_v10 }
  0x3b   :  { %v905_v52 = vmul.f32 %v838_v35, %v838_v35  ;;  %v269_v14 = vmul.f32 0.0007936508, %v892_v3  ;;  %v910_v20 = vmul.f32 %v842_v34, %v842_v34  ;;  %v256_v53 = vmul.f32 %v453_v50, %v880_v57  ;;  %vm926_vm14 = vmor %vm222_vm8, %vm223_vm13 }
  0x3c   :  { %v492_v15 = vpop.eup %491  ;;  %v257_v21 = vmul.f32 %v454_v58, %v887_v62  ;;  %v258_v22 = vmul.f32 %v455_v59, %v895_v11  ;;  %v916_v54 = vmul.f32 %v185_v36, %v669_v2  ;;  %v200_v23 = vsel %vm817_vm3, %v199_v9, %v195_v61 }
  0x3d   :  { %v221_v24 = vadd.f32 %v845_v10, %v220_v4  ;;  %v270_v26 = vmul.f32 0.0007936508, %v905_v52  ;;  %v215_v27 = vsel %vm850_vm12, %v214_v37, %v210_v32  ;;  %vm930_vm15 = vcmp.eq.f32.partialorder %v226_v43, 8.507059e+37 }
  0x3e   :  { %v271_v2 = vmul.f32 0.0007936508, %v910_v20  ;;  %v272_v31 = vsub.f32 0.0027777778, %v268_v12  ;;  %v494_v63 = vpop.eup %493  ;;  %v229_v5 = vor.u32 1.1754944e-38, %v228_v47  ;;  %v456_v33 = vadd.f32 -0.5, %v650_v48 }
  0x3f   :  { %v935_v9 = vmul.f32 0.6931472, %v492_v15  ;;  %v273_v36 = vsub.f32 0.0027777778, %v269_v14  ;;  %v496_v42 = vpop.eup %495  ;;  %v939_v28 = vmul.f32 %v200_v23, %v677_v6  ;;  %v260_v37 = vsub.f32 %v256_v53, %v637_v40 }
  0x40   :  { %v261_v38 = vsub.f32 %v257_v21, %v640_v41  ;;  %v262_v39 = vsub.f32 %v258_v22, %v645_v45  ;;  %v945_v43 = vmul.f32 %v215_v27, %v679_v7  ;;  %v225_v44 = vsel %vm926_vm14, %v845_v10, %v221_v24 }
  0x41   :  { %497 = vlog2.f32 %v664_v0  ;;  %v274_v46 = vsub.f32 0.0027777778, %v270_v26  ;;  %v275_v6 = vsub.f32 0.0027777778, %v271_v2  ;;  %v276_v47 = vmul.f32 %v272_v31, %v869_v49 }
  0x42   :  { %499 = vlog2.f32 %v666_v1  ;;  %v332_v40 = vadd.f32 %v615_v17, %v613_v16  ;;  %v955_v41 = vmul.f32 0.6931472, %v494_v63  ;;  %v957_v45 = vmul.f32 0.6931472, %v496_v42 }
  0x43   :  { %v259_v7 = vmul.f32 %v456_v33, %v935_v9  ;;  %v277_v50 = vmul.f32 %v273_v36, %v892_v3  ;;  %v230_v0 = vsel %vm930_vm15, %v229_v5, %v225_v44  ;;  %v264_v10 = vadd.f32 0.9189385, %v260_v37 }
  0x44   :  { %v265_v51 = vadd.f32 0.9189385, %v261_v38  ;;  %v266_v1 = vadd.f32 0.9189385, %v262_v39  ;;  %v278_v55 = vmul.f32 %v274_v46, %v905_v52  ;;  %v292_v56 = vmul.f32 0.5, %v826_v13 }
  0x45   :  { %v293_v58 = vmul.f32 0.5, %v834_v25  ;;  %v300_v59 = vmul.f32 0.003968254, %v869_v49  ;;  %v279_v60 = vmul.f32 %v275_v6, %v910_v20  ;;  %v280_v61 = vsub.f32 0.083333336, %v276_v47 }
  0x46   :  { %v301_v4 = vmul.f32 0.003968254, %v892_v3  ;;  %v302_v12 = vmul.f32 0.003968254, %v905_v52  ;;  %v263_v14 = vsub.f32 %v259_v7, %v650_v48  ;;  %v281_v15 = vsub.f32 0.083333336, %v277_v50 }
  0x47   :  { %v498_v32 = vpop.eup %497  ;;  %v303_v53 = vmul.f32 0.003968254, %v910_v20  ;;  %v304_v21 = vsub.f32 0.008333334, %v300_v59  ;;  %v294_v23 = vmul.f32 0.5, %v838_v35  ;;  %v295_v24 = vmul.f32 0.5, %v842_v34 }
  0x48   :  { %v500_v22 = vpop.eup %499  ;;  %v305_v26 = vsub.f32 0.008333334, %v301_v4  ;;  %v306_v27 = vsub.f32 0.008333334, %v302_v12  ;;  %v282_v29 = vsub.f32 0.083333336, %v278_v55  ;;  %v296_v30 = vsub.f32 %v880_v57, %v292_v56 }
  0x49   :  { %v307_v2 = vsub.f32 0.008333334, %v303_v53  ;;  %v308_v31 = vmul.f32 %v304_v21, %v869_v49  ;;  %v283_v63 = vsub.f32 0.083333336, %v279_v60  ;;  %v284_v48 = vmul.f32 %v280_v61, %v826_v13 }
  0x4a   :  { %v309_v5 = vmul.f32 %v305_v26, %v892_v3  ;;  %v310_v33 = vmul.f32 %v306_v27, %v905_v52  ;;  %v285_v36 = vmul.f32 %v281_v15, %v834_v25  ;;  %v333_v38 = vadd.f32 %v332_v40, %v617_v18 }
  0x4b   :  { %v311_v42 = vmul.f32 %v307_v2, %v910_v20  ;;  %v312_v37 = vsub.f32 0.083333336, %v308_v31  ;;  %v297_v39 = vsub.f32 %v887_v62, %v293_v58  ;;  %v298_v57 = vsub.f32 %v895_v11, %v294_v23 }
  0x4c   :  { %v313_v44 = vsub.f32 0.083333336, %v309_v5  ;;  %v314_v46 = vsub.f32 0.083333336, %v310_v33  ;;  %v299_v6 = vsub.f32 %v935_v9, %v295_v24  ;;  %v334_v7 = vadd.f32 %v333_v38, %v619_v19 }
  0x4d   :  { %v315_v13 = vsub.f32 0.083333336, %v311_v42  ;;  %v316_v47 = vmul.f32 %v312_v37, %v869_v49  ;;  %v286_v25 = vmul.f32 %v282_v29, %v838_v35  ;;  %v288_v50 = vadd.f32 %v284_v48, %v264_v10 }
  0x4e   :  { %v317_v55 = vmul.f32 %v313_v44, %v892_v3  ;;  %v318_v40 = vmul.f32 %v314_v46, %v905_v52  ;;  %v289_v56 = vadd.f32 %v285_v36, %v265_v51  ;;  %v335_v58 = vrot.slane %v334_v7, 4 }
  0x4f   :  { %v320_v62 = vsub.f32 %v296_v30, %v316_v47  ;;  %v457_v11 = vadd.f32 -1.0, %v613_v16  ;;  %v319_v59 = vmul.f32 %v315_v13, %v910_v20  ;;  %v458_v49 = vadd.f32 -1.0, %v615_v17 }
  0x50   :  { %v321_v9 = vsub.f32 %v297_v39, %v317_v55  ;;  %v322_v60 = vsub.f32 %v298_v57, %v318_v40  ;;  %v231_v61 = vmul.f32 %v230_v0, %v681_v8  ;;  %v245_v4 = vmul.f32 0.6931472, %v498_v32 }
  0x51   :  { %v328_v35 = vsub.f32 %v320_v62, %v916_v54  ;;  %v336_v10 = vadd.f32 %v335_v58, %v334_v7  ;;  %v267_v3 = vadd.f32 0.9189385, %v263_v14  ;;  %v287_v52 = vmul.f32 %v283_v63, %v842_v34 }
  0x52   :  { %v290_v51 = vadd.f32 %v286_v25, %v266_v1  ;;  %v329_v12 = vsub.f32 %v321_v9, %v939_v28  ;;  %v324_v16 = vsub.f32 %v288_v50, %v955_v41  ;;  %v325_v20 = vsub.f32 %v289_v56, %v957_v45 }
  0x53   :  { %v337_v15 = vrot.slane %v336_v10, 2  ;;  %v459_v53 = vadd.f32 -1.0, %v617_v18  ;;  %v323_v17 = vsub.f32 %v299_v6, %v319_v59  ;;  %v330_v8 = vsub.f32 %v322_v60, %v945_v43 }
  0x54   :  { %v345_v0 = vmul.f32 %v457_v11, %v328_v35  ;;  %v346_v32 = vmul.f32 %v458_v49, %v329_v12  ;;  %v247_v21 = vmul.f32 0.6931472, %v500_v22  ;;  %v291_v14 = vadd.f32 %v287_v52, %v267_v3 }
  0x55   :  { %v338_v54 = vadd.f32 %v337_v15, %v336_v10  ;;  %v326_v23 = vsub.f32 %v290_v51, %v245_v4  ;;  %v460_v1 = vadd.f32 -1.0, %v619_v19  ;;  %v331_v28 = vsub.f32 %v323_v17, %v231_v61 }
  0x56   :  { %v347_v24 = vmul.f32 %v459_v53, %v330_v8  ;;  %v349_v41 = vsub.f32 %v345_v0, %v324_v16  ;;  %v350_v26 = vsub.f32 %v346_v32, %v325_v20  ;;  %v327_v22 = vsub.f32 %v291_v14, %v247_v21 }
  0x57   :  { %v339_v34 = vrot.slane %v338_v54, 1  ;;  %v348_v30 = vmul.f32 %v460_v1, %v331_v28 }
  0x58   :  { %v351_v2 = vsub.f32 %v347_v24, %v326_v23  ;;  %v353_v31 = vadd.f32 %v350_v26, %v349_v41 }
  0x59   :  { %v1002_v45 = vadd.f32 %v339_v34, %v338_v54  ;;  %v352_v5 = vsub.f32 %v348_v30, %v327_v22 }
  0x5a   :  { %v354_v33 = vadd.f32 %v353_v31, %v351_v2 }
  0x5b   :  { %v362_v18 = vadd.f32 1.0, %v1002_v45  ;;  %v363_v27 = vadd.f32 2.0, %v1002_v45  ;;  %v364_v43 = vadd.f32 3.0, %v1002_v45  ;;  %v1008_v29 = vadd.f32 4.0, %v1002_v45 }
  0x5c   :  { %v355_v42 = vadd.f32 %v354_v33, %v352_v5  ;;  %v463_v2 = vadd.f32 -32.0, %v1002_v45 }
  0x5d   :  { %v365_v19 = vmul.f32 %v362_v18, %v1002_v45  ;;  %v366_v63 = vmul.f32 %v364_v43, %v363_v27  ;;  %501 = vrcp.f32 %v1008_v29  ;;  %v385_v39 = vand.u32 2147483648, %v1008_v29 }
  0x5e   :  { %503 = vlog2.f32 %v1008_v29  ;;  %vm379_vm0 = vweird.f32 %v1008_v29  ;;  %v383_v46 = vand.u32 2147483647, %v1008_v29  ;;  %v356_v6 = vrot.slane %v355_v42, 4 }
  0x5f   :  { %v367_v48 = vmul.f32 %v366_v63, %v365_v19  ;;  %v386_v7 = vor.u32 1.1754944e-38, %v385_v39  ;;  %v461_v55 = vadd.f32 -0.5, %v1008_v29  ;;  %v368_v62 = vadd.f32 %v364_v43, %v363_v27 }
  0x60   :  { %vm384_vm4 = vcmp.eq.f32.partialorder %v383_v46, 8.507059e+37  ;;  %v357_v56 = vadd.f32 %v356_v6, %v355_v42  ;;  %v370_v11 = vadd.f32 %v362_v18, %v1002_v45 }
  0x61   :  { %505 = vrcp.f32 %v367_v48  ;;  %vm394_vm6 = vweird.f32 %v367_v48  ;;  %v398_v60 = vand.u32 2147483647, %v367_v48  ;;  %v400_v49 = vand.u32 2147483648, %v367_v48 }
  0x62   :  { %v358_v10 = vrot.slane %v357_v56, 2  ;;  %507 = vlog2.f32 %v367_v48  ;;  %v369_v52 = vmul.f32 %v368_v62, %v365_v19  ;;  %v371_v51 = vmul.f32 %v370_v11, %v366_v63 }
  0x63   :  { %v502_v36 = vpop.eup %501  ;;  %vm399_vm11 = vcmp.eq.f32.partialorder %v398_v60, 8.507059e+37  ;;  %v401_v20 = vor.u32 1.1754944e-38, %v400_v49 }
  0x64   :  { %v375_v37 = vmul.f32 %v502_v36, %v1008_v29  ;;  %v504_v38 = vpop.eup %503  ;;  %vm380_vm1 = vweird.f32 %v502_v36  ;;  %v359_v32 = vadd.f32 %v358_v10, %v357_v56  ;;  %v372_v54 = vadd.f32 %v371_v51, %v369_v52 }
  0x65   :  { %vm381_vm2 = vmor %vm379_vm0, %vm380_vm1  ;;  %v405_v50 = vmul.f32 0.6931472, %v504_v38 }
  0x66   :  { %v376_v44 = vsub.f32 1.0, %v375_v37  ;;  %v360_v26 = vrot.slane %v359_v32, 1 }
  0x67   :  { %v506_v57 = vpop.eup %505  ;;  %v410_v61 = vmul.f32 %v461_v55, %v405_v50 }
  0x68   :  { %v390_v13 = vmul.f32 %v506_v57, %v367_v48  ;;  %v377_v47 = vmul.f32 %v502_v36, %v376_v44  ;;  %vm395_vm3 = vweird.f32 %v506_v57  ;;  %v508_v23 = vpop.eup %507  ;;  %v361_v31 = vadd.f32 %v360_v26, %v359_v32 }
  0x69   :  { %vm1019_vm9 = vmor %vm394_vm6, %vm395_vm3  ;;  %v411_v15 = vsub.f32 %v410_v61, %v1008_v29  ;;  %v407_v27 = vmul.f32 0.6931472, %v508_v23 }
  0x6a   :  { %v391_v25 = vsub.f32 1.0, %v390_v13  ;;  %v378_v40 = vadd.f32 %v502_v36, %v377_v47 }
  0x6b   :  { %v412_v1 = vadd.f32 0.9189385, %v411_v15 }
  0x6c   :  { %v392_v58 = vmul.f32 %v506_v57, %v391_v25  ;;  %v382_v59 = vsel %vm381_vm2, %v502_v36, %v378_v40 }
  0x6d   :  { %v387_v9 = vsel %vm384_vm4, %v386_v7, %v382_v59 }
  0x6e   :  { %v393_v4 = vadd.f32 %v506_v57, %v392_v58  ;;  %v408_v35 = vmul.f32 %v387_v9, %v387_v9  ;;  %v419_v8 = vmul.f32 0.5, %v387_v9 }
  0x70   :  { %v413_v12 = vmul.f32 0.0007936508, %v408_v35  ;;  %v421_v16 = vmul.f32 0.003968254, %v408_v35  ;;  %v397_v53 = vsel %vm1019_vm9, %v506_v57, %v393_v4  ;;  %v420_v24 = vsub.f32 %v405_v50, %v419_v8 }
  0x71   :  { %v402_v34 = vsel %vm399_vm11, %v401_v20, %v397_v53 }
  0x72   :  { %v414_v17 = vsub.f32 0.0027777778, %v413_v12  ;;  %v422_v0 = vsub.f32 0.008333334, %v421_v16  ;;  %v403_v18 = vmul.f32 %v402_v34, %v372_v54 }
  0x74   :  { %v415_v21 = vmul.f32 %v414_v17, %v408_v35  ;;  %v423_v14 = vmul.f32 %v422_v0, %v408_v35 }
  0x76   :  { %v416_v28 = vsub.f32 0.083333336, %v415_v21  ;;  %v424_v41 = vsub.f32 0.083333336, %v423_v14 }
  0x78   :  { %v417_v43 = vmul.f32 %v416_v28, %v387_v9  ;;  %v425_v29 = vmul.f32 %v424_v41, %v408_v35 }
  0x7a   :  { %v418_v22 = vadd.f32 %v417_v43, %v412_v1  ;;  %v426_v30 = vsub.f32 %v420_v24, %v425_v29 }
  0x7c   :  { %v427_v19 = vsub.f32 %v418_v22, %v407_v27  ;;  %v428_v63 = vsub.f32 %v426_v30, %v403_v18 }
  0x7e   :  { %v462_v48 = vadd.f32 -78.092224, %v427_v19  ;;  %v432_v5 = vmul.f32 %v463_v2, %v428_v63 }
  0x80   :  { %v430_v33 = vadd.f32 %v462_v48, %v361_v31 }
  0x82   :  { %v433_v36 = vsub.f32 %v430_v33, %v432_v5 }
  0x84   :  { %434 = vst [vmem:[#allocation7] sm:$0x1] %v433_v36 }
  0x85   :  { %445 = dma.vmem_to_hbm [thread:$0]  %s441_s1, 16, %s443_s23, [#allocation4]  }
  0x86   :  { %585 = dma.done.wait [#allocation4], 16  }
  0x87   :  { %586 = vsyncadd [#allocation4], 4294967280 }
  0x88   :  { %450 = vsyncpa [#allocation3], 1 }
  0x89   :  { %451 = vsyncpa [#allocation6], 1 }
  0x8a   :  { %452 = vsyncpa [#allocation4], 1 }

</bundles_post_ra>
